<compile_context>
chip_gen: v6e
topology: v6e:2x2x1
jax: 0.10.0
libtpu: 0.0.40
codegen_flags: <defaults>
</compile_context>

<pallas_src>
import jax
import jax.numpy as jnp
from jax.experimental import pallas as pl
from jax.experimental.pallas import tpu as pltpu


# ----------------------------------------------------------------------------
# Kernel: y[b, :, hw_tile] = W @ x[b, :, hw_tile] + bias   (f32 accumulation)
# ----------------------------------------------------------------------------

def _patch_embed_kernel(x_ref, w_ref, b_ref, o_ref):
    # x_ref: (1, C_in, T_HW)   w_ref: (dim_emb, C_in)   b_ref: (dim_emb, 1) f32
    acc = jnp.dot(w_ref[...], x_ref[0], preferred_element_type=jnp.float32)
    o_ref[0] = (acc + b_ref[...]).astype(o_ref.dtype)


# ----------------------------------------------------------------------------
# PatchEmbeddingLayer forward (both linear_emb branches: identical math)
# ----------------------------------------------------------------------------

def patch_embedding_forward(params, x_nchw, *, compute_dtype=None,
                            max_tile_lanes=2048):
    """Pallas forward of PatchEmbeddingLayer.

    params["w_t"]: (dim_emb, C_in)   -- Conv2d weight (dim_emb, C_in, 1, 1)
                                        squeezed, or the nn.Linear weight; both
                                        are already stored in this layout.
    params["b"]  : (dim_emb,)
    x_nchw       : (B, C_in, H, W) with C_in = dim_in * kernel_size**2
    returns      : (B, dim_emb, H, W)

    compute_dtype=jnp.bfloat16 halves input HBM/VMEM traffic (f32 accumulation
    is kept); default None = compute in the input dtype (f32 reference match).
    """
    w_t, b = params["w_t"], params["b"]
    B, c_in, H, W = x_nchw.shape
    dim_emb = w_t.shape[0]
    assert w_t.shape == (dim_emb, c_in) and b.shape == (dim_emb,)

    HW = H * W
    x = x_nchw.reshape(B, c_in, HW)            # contiguous reshape: free
    if compute_dtype is not None:
        x = x.astype(compute_dtype)
        w_t = w_t.astype(compute_dtype)
    b2 = b.astype(jnp.float32).reshape(dim_emb, 1)   # broadcast over HW lanes

    # HW (lane) tiling: either the full HW extent (full-dim rule covers small /
    # ragged HW) or a 128-multiple tile; partial last blocks are safe because
    # each output column depends only on its own input column.
    if HW <= max_tile_lanes:
        t_hw, n_hw = HW, 1
    else:
        t_hw = (max_tile_lanes // 128) * 128
        n_hw = pl.cdiv(HW, t_hw)

    out = pl.pallas_call(
        _patch_embed_kernel,
        out_shape=jax.ShapeDtypeStruct((B, dim_emb, HW), x_nchw.dtype),
        grid=(B, n_hw),
        in_specs=[
            pl.BlockSpec((1, c_in, t_hw), lambda bi, j: (bi, 0, j)),
            pl.BlockSpec((dim_emb, c_in), lambda bi, j: (0, 0)),
            pl.BlockSpec((dim_emb, 1), lambda bi, j: (0, 0)),
        ],
        out_specs=pl.BlockSpec((1, dim_emb, t_hw), lambda bi, j: (bi, 0, j)),
        compiler_params=pltpu.CompilerParams(
            dimension_semantics=("parallel", "parallel")),
    )(x, w_t, b2)

    return out.reshape(B, dim_emb, H, W)


# ----------------------------------------------------------------------------
# Deterministic init + pure-JAX reference
# ----------------------------------------------------------------------------

def _init_params(key, c_in, dim_emb):
    # PyTorch-style uniform(-1/sqrt(fan_in), 1/sqrt(fan_in)) init.
    k_w, k_b = jax.random.split(key)
    bound = 1.0 / (c_in ** 0.5)
    return {
        "w_t": jax.random.uniform(k_w, (dim_emb, c_in), jnp.float32, -bound, bound),
        "b": jax.random.uniform(k_b, (dim_emb,), jnp.float32, -bound, bound),
    }


def _reference(params, x_nchw):
    y = jnp.einsum("dc,bchw->bdhw", params["w_t"], x_nchw,
                   precision=jax.lax.Precision.HIGHEST)
    return y + params["b"][None, :, None, None]


if __name__ == "__main__":
    key = jax.random.PRNGKey(0)
    fwd = jax.jit(patch_embedding_forward)

    # --- Test 1: conv branch, Segformer stage-0 shapes (dim_in=3, k=7 -> C_in=147)
    dim_in, kernel_size, dim_emb = 3, 7, 16
    B, H, W = 2, 8, 8
    c_in = dim_in * kernel_size ** 2
    key, k_p, k_x = jax.random.split(key, 3)
    params1 = _init_params(k_p, c_in, dim_emb)
    x1 = jax.random.normal(k_x, (B, c_in, H, W), jnp.float32)
    out1 = jax.block_until_ready(fwd(params1, x1))
    assert out1.shape == (B, dim_emb, H, W) and out1.dtype == jnp.float32
    ref1 = _reference(params1, x1)
    assert jnp.allclose(out1, ref1, atol=1e-3, rtol=1e-3), \
        float(jnp.max(jnp.abs(out1 - ref1)))

    # --- Test 2: linear_emb branch (same math, same weight layout)
    dim_in, kernel_size, dim_emb = 4, 2, 32
    B, H, W = 2, 16, 16
    c_in = dim_in * kernel_size ** 2
    key, k_p, k_x = jax.random.split(key, 3)
    params2 = _init_params(k_p, c_in, dim_emb)
    x2 = jax.random.normal(k_x, (B, c_in, H, W), jnp.float32)
    out2 = jax.block_until_ready(fwd(params2, x2))
    assert out2.shape == (B, dim_emb, H, W) and out2.dtype == jnp.float32
    ref2 = _reference(params2, x2)
    assert jnp.allclose(out2, ref2, atol=1e-3, rtol=1e-3), \
        float(jnp.max(jnp.abs(out2 - ref2)))

    # --- Test 3: exercise the HW-tiled grid path (HW = 4096 > max_tile_lanes)
    dim_in, kernel_size, dim_emb = 4, 2, 32
    B, H, W = 1, 64, 64
    c_in = dim_in * kernel_size ** 2
    key, k_p, k_x = jax.random.split(key, 3)
    params3 = _init_params(k_p, c_in, dim_emb)
    x3 = jax.random.normal(k_x, (B, c_in, H, W), jnp.float32)
    out3 = jax.block_until_ready(fwd(params3, x3))
    assert out3.shape == (B, dim_emb, H, W)
    ref3 = _reference(params3, x3)
    assert jnp.allclose(out3, ref3, atol=1e-3, rtol=1e-3), \
        float(jnp.max(jnp.abs(out3 - ref3)))

    print("KERNEL_OK")
</pallas_src>

<mosaic_0001>
module attributes {stable_mosaic.version = 11 : i64} {
  func.func @_patch_embed_kernel(%arg0: i32, %arg1: i32, %arg2: memref<1x147x64xf32, #tpu.memory_space<vmem>>, %arg3: memref<16x147xf32, #tpu.memory_space<vmem>>, %arg4: memref<16x1xf32, #tpu.memory_space<vmem>>, %arg5: memref<1x16x64xf32, #tpu.memory_space<vmem>>) attributes {dimension_semantics = [#tpu.dimension_semantics<parallel>, #tpu.dimension_semantics<parallel>], iteration_bounds = array<i64: 2, 1>, scalar_prefetch = 0 : i64, scratch_operands = 0 : i64, tpu.core_type = #tpu.core_type<tc>, window_params = [{transform_indices = @transform_0, window_bounds = array<i64: 1, 147, 64>}, {pipeline_mode = #tpu.pipeline_mode<synchronous>, transform_indices = @transform_1, window_bounds = array<i64: 16, 147>}, {pipeline_mode = #tpu.pipeline_mode<synchronous>, transform_indices = @transform_2, window_bounds = array<i64: 16, 1>}, {transform_indices = @transform_3, window_bounds = array<i64: 1, 16, 64>}]} {
    %c0 = arith.constant 0 : index
    %c0_0 = arith.constant 0 : index
    %0 = vector.load %arg3[%c0, %c0_0] : memref<16x147xf32, #tpu.memory_space<vmem>>, vector<16x147xf32>
    %c0_1 = arith.constant 0 : index
    %c0_2 = arith.constant 0 : index
    %c0_3 = arith.constant 0 : index
    %1 = vector.load %arg2[%c0_1, %c0_2, %c0_3] : memref<1x147x64xf32, #tpu.memory_space<vmem>>, vector<1x147x64xf32>
    %2 = vector.shape_cast %1 : vector<1x147x64xf32> to vector<147x64xf32>
    %cst = arith.constant dense<0.000000e+00> : vector<16x64xf32>
    %3 = tpu.matmul %0, %2, %cst {dimension_numbers = #tpu.dot_dimension_numbers<[1], [0], [0], [1], [0, 0, 1, 1], [], []>} : vector<16x147xf32>, vector<147x64xf32>, vector<16x64xf32> -> vector<16x64xf32>
    %c0_4 = arith.constant 0 : index
    %c0_5 = arith.constant 0 : index
    %4 = vector.load %arg4[%c0_4, %c0_5] : memref<16x1xf32, #tpu.memory_space<vmem>>, vector<16x1xf32>
    %5 = vector.broadcast %4 : vector<16x1xf32> to vector<16x64xf32>
    %6 = arith.addf %3, %5 : vector<16x64xf32>
    %c0_6 = arith.constant 0 : index
    %c0_7 = arith.constant 0 : index
    %c0_8 = arith.constant 0 : index
    %7 = vector.load %arg5[%c0_6, %c0_7, %c0_8] : memref<1x16x64xf32, #tpu.memory_space<vmem>>, vector<1x16x64xf32>
    %8 = vector.shape_cast %7 : vector<1x16x64xf32> to vector<16x64xf32>
    %9 = vector.shape_cast %6 : vector<16x64xf32> to vector<1x16x64xf32>
    tpu.vector_store %arg5[%c0_6, %c0_7, %c0_8], %9 {strides = array<i32>} : memref<1x16x64xf32, #tpu.memory_space<vmem>>, vector<1x16x64xf32>,
    return
  }
  func.func @transform_0(%arg0: i32, %arg1: i32) -> (i32, i32, i32) {
    %c0_i32 = arith.constant 0 : i32
    %c0_i32_0 = arith.constant 0 : i32
    return %arg0, %c0_i32, %arg1 : i32, i32, i32
  }
  func.func @transform_1(%arg0: i32, %arg1: i32) -> (i32, i32) {
    %c0_i32 = arith.constant 0 : i32
    %c0_i32_0 = arith.constant 0 : i32
    %c0_i32_1 = arith.constant 0 : i32
    return %c0_i32, %c0_i32_0 : i32, i32
  }
  func.func @transform_2(%arg0: i32, %arg1: i32) -> (i32, i32) {
    %c0_i32 = arith.constant 0 : i32
    %c0_i32_0 = arith.constant 0 : i32
    %c0_i32_1 = arith.constant 0 : i32
    return %c0_i32, %c0_i32_0 : i32, i32
  }
  func.func @transform_3(%arg0: i32, %arg1: i32) -> (i32, i32, i32) {
    %c0_i32 = arith.constant 0 : i32
    %c0_i32_0 = arith.constant 0 : i32
    return %arg0, %c0_i32, %arg1 : i32, i32, i32
  }
}

</mosaic_0001>

<bundles_post_ra>
// kernel: patch_embedding_forward.1
= control target key start
LH: loop header
LB: loop body
LE: loop exit
PB: predicated region body
PF: predicated region fallthrough
CT: control target
= control target key end

     0   :  { %s535_s12 = smov 0   ;;  %s537_s13 = smov 0   ;;  %s649_s0 = inlined_call_operand.vmem [shape: f32[2,147,64], index: 0, kind: input, shape index: {}]   ;;  %s650_s1 = inlined_call_operand.vmem [shape: f32[16,147], index: 1, kind: input, shape index: {}]   ;;  %s651_s2 = inlined_call_operand.vmem [shape: f32[16,1], index: 2, kind: input, shape index: {}]   ;;  %s652_s3 = inlined_call_operand.vmem [shape: f32[2,16,64], index: 3, kind: output, shape index: {}]  }
   0x1   :  { %s539_s14 = smov 0  }
   0x2 LB: > { %s25_s15 = sadd.s32 1, %s507_s13  ;;  %p413_p0 = scmp.ge.s32.totalorder %s511_s14, 1  ;;  %s511_s14 = sphi %s539_s14, %s13_s14   ;;  %s507_s13 = sphi %s537_s13, %s654_s13   ;;  %s503_s12 = sphi %s535_s12, %s653_s12  }
   0x3   : > { %p27_p1 = scmp.ge.s32.totalorder %s25_s15, 2  ;;  %p156_p2 = scmp.lt.s32.totalorder %s511_s14, 3 }
   0x5   : > { %s656_s15 = smov (%p27_p1, %s25_s15), 0  ;;  %p157_p3 = pnand %p413_p0, %p156_p2 }
   0x6   : > { %p186_p4 = scmp.lt.s32.totalorder (!%p157_p3), %s503_s12, 1 }
   0x7   : > { %160 = sbr.rel (%p157_p3) target bundleno = 250 (0xfa), region = 32 }
   0xc   : > { %v203_v0 = vld [vmem:[%s650_s1 + $0x8] sm:$0xff]  ;;  %vm237_vm0 = vcmask 154624   ;;  %v205_v1 = vld [vmem:[%s650_s1 + $0x18] sm:$0xff]  ;;  %v513_v2 = vmov 0.0   ;;  %v225_v3 = vld [vmem:[%s651_s2] sm:$0xff]  ;;  %s658_s12 = smov (!%p186_p4, %s503_s12), 1 }
   0xd   : > { %248 = vmatprep.subr.mxu0 %v513_v2  ;;  %423 = vmatprep.subr.mxu1 %v513_v2  ;;  %v514_v4 = vmov 0   ;;  %s461_s22 = smul.u32 152, %s658_s12  ;;  %vm244_vm1 = vcmask 1042432   ;;  %v202_v24 = vld [vmem:[%s650_s1] sm:$0xff]  ;;  %v204_v25 = vld [vmem:[%s650_s1 + $0x10] sm:$0xff]  ;;  %v226_v26 = vld [vmem:[%s651_s2 + $0x8] sm:$0xff] }
   0xe   : > { %418 = vmatprep.mubr.msk.f32.mxu0 %vm237_vm0, %v203_v0  ;;  %419 = vmatprep.mubr.msk.f32.mxu1 %vm237_vm0, %v205_v1  ;;  %s422_s5 = sshll.u32 %s658_s12, 4  ;;  %vm323_vm2 = vcmask 523264  }
   0xf   : > { %488 = vset.pattern.permute.xlu0 %v514_v4  ;;  %s570_s25 = scalar_lea.vmem %s649_s0, %s461_s22  ;;  %s201_s8 = scalar_lea.vmem %s652_s3, %s422_s5 }
  0x10   : > { %229 = vperm.xlu0 %488, %v225_v3   ;;  %v221_v5 = vld [vmem:[%s570_s25 + $0x78] sm:$0xff]  ;;  %v220_v6 = vld [vmem:[%s570_s25 + $0x70] sm:$0xff]  ;;  %v219_v7 = vld [vmem:[%s570_s25 + $0x68] sm:$0xff] }
  0x11   : > { %249 = vmatpush1.msra.mxu0 %v221_v5  ;;  %442 = vmatpush1.msra.mxu1 %v221_v5  ;;  %v218_v8 = vld [vmem:[%s570_s25 + $0x60] sm:$0xff]  ;;  %v217_v9 = vld [vmem:[%s570_s25 + $0x58] sm:$0xff]  ;;  %v216_v10 = vld [vmem:[%s570_s25 + $0x50] sm:$0xff] }
  0x12   : > { %250 = vmatprep.subr.mxu0 %v513_v2  ;;  %424 = vmatprep.subr.mxu1 %v513_v2  ;;  %v215_v11 = vld [vmem:[%s570_s25 + $0x48] sm:$0xff]  ;;  %v214_v12 = vld [vmem:[%s570_s25 + $0x40] sm:$0xff]  ;;  %v213_v13 = vld [vmem:[%s570_s25 + $0x38] sm:$0xff] }
  0x13   : > { %251 = vmatpush1.msra.mxu0 %v220_v6  ;;  %443 = vmatpush1.msra.mxu1 %v220_v6  ;;  %v212_v14 = vld [vmem:[%s570_s25 + $0x30] sm:$0xff]  ;;  %v211_v15 = vld [vmem:[%s570_s25 + $0x28] sm:$0xff]  ;;  %v210_v16 = vld [vmem:[%s570_s25 + $0x20] sm:$0xff] }
  0x14   : > { %252 = vmatprep.subr.mxu0 %v513_v2  ;;  %425 = vmatprep.subr.mxu1 %v513_v2  ;;  %v209_v17 = vld [vmem:[%s570_s25 + $0x18] sm:$0xff]  ;;  %v208_v18 = vld [vmem:[%s570_s25 + $0x10] sm:$0xff]  ;;  %v207_v19 = vld [vmem:[%s570_s25 + $0x8] sm:$0xff] }
  0x15   : > { %253 = vmatpush1.msra.mxu0 %v219_v7  ;;  %444 = vmatpush1.msra.mxu1 %v219_v7  ;;  %v206_v20 = vld [vmem:[%s570_s25] sm:$0xff]  ;;  %v224_v21 = vld [vmem:[%s570_s25 + $0x90] sm:$0x7]  ;;  %v223_v22 = vld [vmem:[%s570_s25 + $0x88] sm:$0xff] }
  0x16   : > { %254 = vmatprep.subr.mxu0 %v513_v2  ;;  %426 = vmatprep.subr.mxu1 %v513_v2  ;;  %v222_v23 = vld [vmem:[%s570_s25 + $0x80] sm:$0xff] }
  0x17   : > { %255 = vmatpush1.msra.mxu0 %v218_v8  ;;  %445 = vmatpush1.msra.mxu1 %v218_v8 }
  0x18   : > { %256 = vmatprep.subr.mxu0 %v513_v2  ;;  %427 = vmatprep.subr.mxu1 %v513_v2 }
  0x19   : > { %257 = vmatpush1.msra.mxu0 %v217_v9  ;;  %446 = vmatpush1.msra.mxu1 %v217_v9 }
  0x1a   : > { %258 = vmatprep.subr.mxu0 %v513_v2  ;;  %428 = vmatprep.subr.mxu1 %v513_v2 }
  0x1b   : > { %259 = vmatpush1.msra.mxu0 %v216_v10  ;;  %447 = vmatpush1.msra.mxu1 %v216_v10 }
  0x1c   : > { %260 = vmatprep.subr.mxu0 %v513_v2  ;;  %429 = vmatprep.subr.mxu1 %v513_v2 }
  0x1d   : > { %261 = vmatpush1.msra.mxu0 %v215_v11  ;;  %448 = vmatpush1.msra.mxu1 %v215_v11 }
  0x1e   : > { %262 = vmatprep.subr.mxu0 %v513_v2  ;;  %430 = vmatprep.subr.mxu1 %v513_v2 }
  0x1f   : > { %263 = vmatpush1.msra.mxu0 %v214_v12  ;;  %449 = vmatpush1.msra.mxu1 %v214_v12 }
  0x20   : > { %264 = vmatprep.subr.mxu0 %v513_v2  ;;  %431 = vmatprep.subr.mxu1 %v513_v2 }
  0x21   : > { %265 = vmatpush1.msra.mxu0 %v213_v13  ;;  %450 = vmatpush1.msra.mxu1 %v213_v13 }
  0x22   : > { %266 = vmatprep.subr.mxu0 %v513_v2  ;;  %432 = vmatprep.subr.mxu1 %v513_v2 }
  0x23   : > { %267 = vmatpush1.msra.mxu0 %v212_v14  ;;  %451 = vmatpush1.msra.mxu1 %v212_v14 }
  0x24   : > { %268 = vmatprep.subr.mxu0 %v513_v2  ;;  %433 = vmatprep.subr.mxu1 %v513_v2 }
  0x25   : > { %269 = vmatpush1.msra.mxu0 %v211_v15  ;;  %452 = vmatpush1.msra.mxu1 %v211_v15 }
  0x26   : > { %270 = vmatprep.subr.mxu0 %v513_v2  ;;  %434 = vmatprep.subr.mxu1 %v513_v2 }
  0x27   : > { %271 = vmatpush1.msra.mxu0 %v210_v16  ;;  %453 = vmatpush1.msra.mxu1 %v210_v16 }
  0x28   : > { %272 = vmatprep.subr.mxu0 %v513_v2  ;;  %435 = vmatprep.subr.mxu1 %v513_v2 }
  0x29   : > { %273 = vmatpush1.msra.mxu0 %v209_v17  ;;  %454 = vmatpush1.msra.mxu1 %v209_v17 }
  0x2a   : > { %274 = vmatprep.subr.mxu0 %v513_v2  ;;  %436 = vmatprep.subr.mxu1 %v513_v2 }
  0x2b   : > { %275 = vmatpush1.msra.mxu0 %v208_v18  ;;  %455 = vmatpush1.msra.mxu1 %v208_v18 }
  0x2c   : > { %276 = vmatprep.subr.mxu0 %v513_v2  ;;  %437 = vmatprep.subr.mxu1 %v513_v2 }
  0x2d   : > { %277 = vmatpush1.msra.mxu0 %v207_v19  ;;  %456 = vmatpush1.msra.mxu1 %v207_v19 }
  0x2e   : > { %278 = vmatprep.subr.mxu0 %v513_v2  ;;  %438 = vmatprep.subr.mxu1 %v513_v2 }
  0x2f   : > { %279 = vmatpush1.msra.mxu0 %v206_v20  ;;  %457 = vmatpush1.msra.mxu1 %v206_v20 }
  0x30   : > { %306 = vmatprep.subr.mxu0 %v513_v2  ;;  %439 = vmatprep.subr.mxu1 %v513_v2 }
  0x31   : > { %417 = vmatpush2.msk.msra.mxu0 %vm244_vm1, %v224_v21  ;;  %458 = vmatpush2.msk.msra.mxu1 %vm244_vm1, %v224_v21 }
  0x32   : > { %308 = vmatprep.subr.mxu0 %v513_v2  ;;  %440 = vmatprep.subr.mxu1 %v513_v2 }
  0x33   : > { %309 = vmatpush2.msra.mxu0 %v223_v22  ;;  %459 = vmatpush2.msra.mxu1 %v223_v22 }
  0x34   : > { %310 = vmatprep.subr.mxu0 %v513_v2  ;;  %441 = vmatprep.subr.mxu1 %v513_v2 }
  0x35   : > { %311 = vmatpush2.msra.mxu0 %v222_v23  ;;  %460 = vmatpush2.msra.mxu1 %v222_v23 }
  0x36   : > { %313 = vmatmul.mubr.f32.vlgmr.msra.gmra.mxu0 %v202_v24  ;;  %318 = vmatmul.mubr.f32.vlgmr.msra.gmra.mxu1 %v204_v25 }
  0x37   : > { %234 = vperm.xlu0 %488, %v226_v26  }
  0x8b   : > { %v230_v27 = vpop.permute.xlu0 %229 }
  0xb2   : > { %v235_v28 = vpop.permute.xlu0 %234 }
  0xf6   : > { %v314_v29 = vpop.f32.mrf.mxu0  ;;  %v319_v30 = vpop.f32.mrf.mxu1 }
  0xf7   : > { %v315_v31 = vadd.f32 %v314_v29, %v230_v27  ;;  %v320_v32 = vadd.f32 %v319_v30, %v235_v28 }
  0xf8   : > { %v316_v33 = vpop.f32.mrf.mxu0  ;;  %v321_v34 = vpop.f32.mrf.mxu1 }
  0xf9   : > { %324 = vst.msk [vmem:[%s201_s8] sm:$0xff] %vm323_vm2, %v315_v31  ;;  %325 = vst.msk [vmem:[%s201_s8 + $0x8] sm:$0xff] %vm323_vm2, %v320_v32 }
  0xfa PF: > { %s13_s14 = sadd.s32 1, %s511_s14   ;;  %s653_s12 = smov %s507_s13 }
  0xfb   : > { %p10_p5 = scmp.ge.s32.totalorder %s13_s14, 4   ;;  %s654_s13 = smov %s656_s15 }
  0xfd   :  { %12 = sbr.rel (!%p10_p5) target bundleno = 2 (0x2), region = 62 }

</bundles_post_ra>
